<compile_context>
chip_gen: v7x
topology: tpu7x:2x2x1
jax: 0.10.0
libtpu: 0.0.40
codegen_flags: <defaults>
</compile_context>

<pallas_src>
import jax
import jax.numpy as jnp
import numpy as np
from jax.experimental import pallas as pl
from jax.experimental.pallas import tpu as pltpu


_BATCH_PAD = 8      # sublane width
_CLASS_PAD = 128    # lane width


# ----------------------------- Pallas kernel -------------------------------
def rnn_classify_kernel(ids_ref,   # (T*Bp, 1) int32  token ids, time-major, batch-padded
                        emb_ref,   # (V, E)     f32   embedding table
                        w_ref,     # (L, E+H, H) f32  stacked [W_ih; W_hh] (pre-transposed)
                        b_ref,     # (L, 1, H)  f32   b_ih + b_hh
                        wc_ref,    # (H, Cp)    f32   classifier weight (pre-T, lane-padded)
                        bc_ref,    # (1, Cp)    f32   classifier bias (-1e30 in padded lanes)
                        out_ref):  # (Bp, Cp)   f32   softmax probabilities
    Bp = out_ref.shape[0]
    T = ids_ref.shape[0] // Bp
    V, E = emb_ref.shape
    L = w_ref.shape[0]
    H = w_ref.shape[2]

    # ---- Fused embedding gather: one-hot(ids) @ emb on the MXU (exact). ----
    ids = ids_ref[...]                                            # (T*Bp, 1)
    iota_v = jax.lax.broadcasted_iota(jnp.int32, (T * Bp, V), 1)  # (T*Bp, V)
    onehot = (iota_v == ids).astype(jnp.float32)
    x_all = jnp.dot(onehot, emb_ref[...],
                    preferred_element_type=jnp.float32)           # (T*Bp, E)

    # ---- Multi-layer tanh RNN (nn.RNN default), h0 = 0; h stays in vregs. ----
    h = [jnp.zeros((Bp, H), jnp.float32) for _ in range(L)]
    for t in range(T):                         # static unroll -> one basic block
        inp = x_all[t * Bp:(t + 1) * Bp, :]                       # (Bp, E)
        for l in range(L):
            xh = jnp.concatenate([inp, h[l]], axis=1)             # (Bp, E+H)
            pre = jnp.dot(xh, w_ref[l],
                          preferred_element_type=jnp.float32) + b_ref[l]
            h[l] = jnp.tanh(pre)                                  # (Bp, H)
            inp = h[l]

    # ---- Last timestep of last layer -> Linear -> softmax(dim=-1). ----
    logits = (jnp.dot(h[L - 1], wc_ref[...],
                      preferred_element_type=jnp.float32)
              + bc_ref[...])                                      # (Bp, Cp)
    m = jnp.max(logits, axis=-1, keepdims=True)
    e = jnp.exp(logits - m)                    # padded lanes underflow to 0
    s = jnp.sum(e, axis=-1, keepdims=True)
    inv = pl.reciprocal(s, approx=True)        # EUP (off the VALU path)
    inv = inv * (2.0 - s * inv)                # one Newton step -> ~exact
    out_ref[...] = e * inv                     # (8, 128) lane/sublane-dense store

    # TODO(synk): CrossEntropyLoss branch (forward(x, y) with y != None) is not
    # implemented in the kernel; only the inference (softmax) path is provided.


# ------------------------------ JAX wrapper ---------------------------------
@jax.jit
def torch_model_forward(token_ids, params):
    """token_ids: (B, T) int32.  Returns softmax probs (B, num_classes + 1)."""
    emb = params["embedding"]                # (V, E)
    w_ih = params["w_ih"]                    # (L, E, H)  pre-transposed (in, out)
    w_hh = params["w_hh"]                    # (L, H, H)
    b_ih = params["b_ih"]                    # (L, 1, H)
    b_hh = params["b_hh"]                    # (L, 1, H)
    w_cls = params["w_cls"]                  # (H, C)
    b_cls = params["b_cls"]                  # (1, C)

    B, T = token_ids.shape
    H = w_hh.shape[2]
    C = w_cls.shape[1]
    Bp = _BATCH_PAD
    Cp = _CLASS_PAD

    # Batch-pad token ids with the padding token (0), lay out time-major.
    ids_pad = jnp.zeros((Bp, T), jnp.int32).at[:B, :].set(token_ids.astype(jnp.int32))
    ids_col = jnp.transpose(ids_pad, (1, 0)).reshape(T * Bp, 1)

    # Fuse per-layer weights/biases:  [x, h] @ [[W_ih], [W_hh]] + (b_ih + b_hh).
    w_stack = jnp.concatenate([w_ih, w_hh], axis=1)      # (L, E+H, H)
    b_stack = b_ih + b_hh                                # (L, 1, H)

    # Lane-pad the classifier; padded classes get -1e30 bias -> softmax prob 0.
    wc_pad = jnp.zeros((H, Cp), jnp.float32).at[:, :C].set(w_cls)
    bc_pad = jnp.full((1, Cp), -1e30, jnp.float32).at[:, :C].set(b_cls)

    vmem = pl.BlockSpec(memory_space=pltpu.MemorySpace.VMEM)
    out = pl.pallas_call(
        rnn_classify_kernel,
        out_shape=jax.ShapeDtypeStruct((Bp, Cp), jnp.float32),
        in_specs=[vmem] * 6,
        out_specs=vmem,
        # Gridless single invocation; all operands (<100 KB) stay VMEM-resident.
        # If B/T/H ever grow: add a grid over batch tiles with
        # dimension_semantics=("parallel",) (v7x has 2 TCs) and BlockSpec
        # pipelining so the working set respects the 64 MiB v7x VMEM cap.
    )(ids_col, emb, w_stack, b_stack, wc_pad, bc_pad)
    return out[:B, :C]


# --------------------------- Pure-JAX reference ------------------------------
def reference_forward(token_ids, params):
    emb = params["embedding"]
    x = emb[token_ids]                       # (B, T, E)
    L = params["w_ih"].shape[0]
    B, T, _ = x.shape
    H = params["w_hh"].shape[2]
    seq = x.astype(jnp.float32)
    for l in range(L):
        h = jnp.zeros((B, H), jnp.float32)
        outs = []
        for t in range(T):
            h = jnp.tanh(seq[:, t, :] @ params["w_ih"][l] + params["b_ih"][l]
                         + h @ params["w_hh"][l] + params["b_hh"][l])
            outs.append(h)
        seq = jnp.stack(outs, axis=1)
    logits = seq[:, -1, :] @ params["w_cls"] + params["b_cls"]
    return jax.nn.softmax(logits, axis=-1)


# --------------------------------- main --------------------------------------
if __name__ == "__main__":
    # Synthetic config (small shapes consistent with the module's forward).
    VOCAB = 30
    EMB_DIM = 32          # embedding_dim
    HIDDEN = 32           # hidden_size (== embedding_dim, see note above)
    LAYERS = 2            # num_layers
    NUM_CLASSES = 4       # -> classifier outputs num_classes + 1 = 5
    C = NUM_CLASSES + 1
    B, T = 2, 8

    key = jax.random.PRNGKey(0)
    ks = jax.random.split(key, 8)

    # Deterministic parameter init (synthetic; not a checkpoint load).
    embedding = 0.1 * jax.random.normal(ks[0], (VOCAB, EMB_DIM), jnp.float32)
    embedding = embedding.at[0].set(0.0)     # padding_idx=0

    w_ih = 0.1 * jax.random.normal(ks[1], (LAYERS, EMB_DIM, HIDDEN), jnp.float32)
    w_hh = 0.1 * jax.random.normal(ks[2], (LAYERS, HIDDEN, HIDDEN), jnp.float32)
    b_ih = 0.1 * jax.random.normal(ks[3], (LAYERS, 1, HIDDEN), jnp.float32)
    b_hh = 0.1 * jax.random.normal(ks[4], (LAYERS, 1, HIDDEN), jnp.float32)
    w_cls = 0.1 * jax.random.normal(ks[5], (HIDDEN, C), jnp.float32)
    b_cls = 0.1 * jax.random.normal(ks[6], (1, C), jnp.float32)

    params = dict(embedding=embedding, w_ih=w_ih, w_hh=w_hh,
                  b_ih=b_ih, b_hh=b_hh, w_cls=w_cls, b_cls=b_cls)

    token_ids = jax.random.randint(ks[7], (B, T), 0, VOCAB, dtype=jnp.int32)

    probs = torch_model_forward(token_ids, params)
    probs = jax.block_until_ready(probs)

    ref = jax.block_until_ready(reference_forward(token_ids, params))
    assert probs.shape == (B, C)
    assert np.allclose(np.asarray(probs), np.asarray(ref), atol=1e-5, rtol=1e-5)
    assert np.allclose(np.asarray(probs).sum(-1), 1.0, atol=1e-5)

    print("KERNEL_OK")
</pallas_src>

<mosaic_0001>
module attributes {stable_mosaic.version = 11 : i64} {
  func.func @rnn_classify_kernel(%arg0: memref<64x1xi32, #tpu.memory_space<vmem>>, %arg1: memref<30x32xf32, #tpu.memory_space<vmem>>, %arg2: memref<2x64x32xf32, #tpu.memory_space<vmem>>, %arg3: memref<2x1x32xf32, #tpu.memory_space<vmem>>, %arg4: memref<32x128xf32, #tpu.memory_space<vmem>>, %arg5: memref<1x128xf32, #tpu.memory_space<vmem>>, %arg6: memref<8x128xf32, #tpu.memory_space<vmem>>) attributes {dimension_semantics = [], scalar_prefetch = 0 : i64, scratch_operands = 0 : i64, tpu.core_type = #tpu.core_type<tc>} {
    %c0 = arith.constant 0 : index
    %c0_0 = arith.constant 0 : index
    %0 = vector.load %arg0[%c0, %c0_0] : memref<64x1xi32, #tpu.memory_space<vmem>>, vector<64x1xi32>
    %1 = tpu.iota {dimensions = array<i32: 1>} : vector<64x30xi32>
    %2 = vector.broadcast %0 : vector<64x1xi32> to vector<64x30xi32>
    %3 = arith.cmpi eq, %1, %2 : vector<64x30xi32>
    %4 = arith.extui %3 : vector<64x30xi1> to vector<64x30xi32>
    %5 = arith.sitofp %4 : vector<64x30xi32> to vector<64x30xf32>
    %c0_1 = arith.constant 0 : index
    %c0_2 = arith.constant 0 : index
    %6 = vector.load %arg1[%c0_1, %c0_2] : memref<30x32xf32, #tpu.memory_space<vmem>>, vector<30x32xf32>
    %cst = arith.constant dense<0.000000e+00> : vector<64x32xf32>
    %7 = tpu.matmul %5, %6, %cst {dimension_numbers = #tpu.dot_dimension_numbers<[1], [0], [0], [1], [0, 0, 1, 1], [], []>} : vector<64x30xf32>, vector<30x32xf32>, vector<64x32xf32> -> vector<64x32xf32>
    %cst_3 = arith.constant 0.000000e+00 : f32
    %8 = vector.broadcast %cst_3 : f32 to vector<8x32xf32>
    %cst_4 = arith.constant 0.000000e+00 : f32
    %9 = vector.broadcast %cst_4 : f32 to vector<8x32xf32>
    %10 = vector.extract_strided_slice %7 {offsets = [0, 0], sizes = [8, 32], strides = [1, 1]} : vector<64x32xf32> to vector<8x32xf32>
    %11 = tpu.concatenate %10, %8 in 1 : vector<8x32xf32>, vector<8x32xf32> -> vector<8x64xf32>
    %c0_5 = arith.constant 0 : index
    %c0_6 = arith.constant 0 : index
    %c0_7 = arith.constant 0 : index
    %12 = vector.load %arg2[%c0_5, %c0_6, %c0_7] : memref<2x64x32xf32, #tpu.memory_space<vmem>>, vector<1x64x32xf32>
    %13 = vector.shape_cast %12 : vector<1x64x32xf32> to vector<64x32xf32>
    %cst_8 = arith.constant dense<0.000000e+00> : vector<8x32xf32>
    %14 = tpu.matmul %11, %13, %cst_8 {dimension_numbers = #tpu.dot_dimension_numbers<[1], [0], [0], [1], [0, 0, 1, 1], [], []>} : vector<8x64xf32>, vector<64x32xf32>, vector<8x32xf32> -> vector<8x32xf32>
    %c0_9 = arith.constant 0 : index
    %c0_10 = arith.constant 0 : index
    %c0_11 = arith.constant 0 : index
    %15 = vector.load %arg3[%c0_9, %c0_10, %c0_11] : memref<2x1x32xf32, #tpu.memory_space<vmem>>, vector<1x1x32xf32>
    %16 = vector.shape_cast %15 : vector<1x1x32xf32> to vector<1x32xf32>
    %17 = vector.broadcast %16 : vector<1x32xf32> to vector<8x32xf32>
    %18 = arith.addf %14, %17 : vector<8x32xf32>
    %19 = math.tanh %18 : vector<8x32xf32>
    %20 = tpu.concatenate %19, %9 in 1 : vector<8x32xf32>, vector<8x32xf32> -> vector<8x64xf32>
    %c1 = arith.constant 1 : index
    %c0_12 = arith.constant 0 : index
    %c0_13 = arith.constant 0 : index
    %21 = vector.load %arg2[%c1, %c0_12, %c0_13] : memref<2x64x32xf32, #tpu.memory_space<vmem>>, vector<1x64x32xf32>
    %22 = vector.shape_cast %21 : vector<1x64x32xf32> to vector<64x32xf32>
    %cst_14 = arith.constant dense<0.000000e+00> : vector<8x32xf32>
    %23 = tpu.matmul %20, %22, %cst_14 {dimension_numbers = #tpu.dot_dimension_numbers<[1], [0], [0], [1], [0, 0, 1, 1], [], []>} : vector<8x64xf32>, vector<64x32xf32>, vector<8x32xf32> -> vector<8x32xf32>
    %c1_15 = arith.constant 1 : index
    %c0_16 = arith.constant 0 : index
    %c0_17 = arith.constant 0 : index
    %24 = vector.load %arg3[%c1_15, %c0_16, %c0_17] : memref<2x1x32xf32, #tpu.memory_space<vmem>>, vector<1x1x32xf32>
    %25 = vector.shape_cast %24 : vector<1x1x32xf32> to vector<1x32xf32>
    %26 = vector.broadcast %25 : vector<1x32xf32> to vector<8x32xf32>
    %27 = arith.addf %23, %26 : vector<8x32xf32>
    %28 = math.tanh %27 : vector<8x32xf32>
    %29 = vector.extract_strided_slice %7 {offsets = [8, 0], sizes = [8, 32], strides = [1, 1]} : vector<64x32xf32> to vector<8x32xf32>
    %30 = tpu.concatenate %29, %19 in 1 : vector<8x32xf32>, vector<8x32xf32> -> vector<8x64xf32>
    %c0_18 = arith.constant 0 : index
    %c0_19 = arith.constant 0 : index
    %c0_20 = arith.constant 0 : index
    %31 = vector.load %arg2[%c0_18, %c0_19, %c0_20] : memref<2x64x32xf32, #tpu.memory_space<vmem>>, vector<1x64x32xf32>
    %32 = vector.shape_cast %31 : vector<1x64x32xf32> to vector<64x32xf32>
    %cst_21 = arith.constant dense<0.000000e+00> : vector<8x32xf32>
    %33 = tpu.matmul %30, %32, %cst_21 {dimension_numbers = #tpu.dot_dimension_numbers<[1], [0], [0], [1], [0, 0, 1, 1], [], []>} : vector<8x64xf32>, vector<64x32xf32>, vector<8x32xf32> -> vector<8x32xf32>
    %c0_22 = arith.constant 0 : index
    %c0_23 = arith.constant 0 : index
    %c0_24 = arith.constant 0 : index
    %34 = vector.load %arg3[%c0_22, %c0_23, %c0_24] : memref<2x1x32xf32, #tpu.memory_space<vmem>>, vector<1x1x32xf32>
    %35 = vector.shape_cast %34 : vector<1x1x32xf32> to vector<1x32xf32>
    %36 = vector.broadcast %35 : vector<1x32xf32> to vector<8x32xf32>
    %37 = arith.addf %33, %36 : vector<8x32xf32>
    %38 = math.tanh %37 : vector<8x32xf32>
    %39 = tpu.concatenate %38, %28 in 1 : vector<8x32xf32>, vector<8x32xf32> -> vector<8x64xf32>
    %c1_25 = arith.constant 1 : index
    %c0_26 = arith.constant 0 : index
    %c0_27 = arith.constant 0 : index
    %40 = vector.load %arg2[%c1_25, %c0_26, %c0_27] : memref<2x64x32xf32, #tpu.memory_space<vmem>>, vector<1x64x32xf32>
    %41 = vector.shape_cast %40 : vector<1x64x32xf32> to vector<64x32xf32>
    %cst_28 = arith.constant dense<0.000000e+00> : vector<8x32xf32>
    %42 = tpu.matmul %39, %41, %cst_28 {dimension_numbers = #tpu.dot_dimension_numbers<[1], [0], [0], [1], [0, 0, 1, 1], [], []>} : vector<8x64xf32>, vector<64x32xf32>, vector<8x32xf32> -> vector<8x32xf32>
    %c1_29 = arith.constant 1 : index
    %c0_30 = arith.constant 0 : index
    %c0_31 = arith.constant 0 : index
    %43 = vector.load %arg3[%c1_29, %c0_30, %c0_31] : memref<2x1x32xf32, #tpu.memory_space<vmem>>, vector<1x1x32xf32>
    %44 = vector.shape_cast %43 : vector<1x1x32xf32> to vector<1x32xf32>
    %45 = vector.broadcast %44 : vector<1x32xf32> to vector<8x32xf32>
    %46 = arith.addf %42, %45 : vector<8x32xf32>
    %47 = math.tanh %46 : vector<8x32xf32>
    %48 = vector.extract_strided_slice %7 {offsets = [16, 0], sizes = [8, 32], strides = [1, 1]} : vector<64x32xf32> to vector<8x32xf32>
    %49 = tpu.concatenate %48, %38 in 1 : vector<8x32xf32>, vector<8x32xf32> -> vector<8x64xf32>
    %c0_32 = arith.constant 0 : index
    %c0_33 = arith.constant 0 : index
    %c0_34 = arith.constant 0 : index
    %50 = vector.load %arg2[%c0_32, %c0_33, %c0_34] : memref<2x64x32xf32, #tpu.memory_space<vmem>>, vector<1x64x32xf32>
    %51 = vector.shape_cast %50 : vector<1x64x32xf32> to vector<64x32xf32>
    %cst_35 = arith.constant dense<0.000000e+00> : vector<8x32xf32>
    %52 = tpu.matmul %49, %51, %cst_35 {dimension_numbers = #tpu.dot_dimension_numbers<[1], [0], [0], [1], [0, 0, 1, 1], [], []>} : vector<8x64xf32>, vector<64x32xf32>, vector<8x32xf32> -> vector<8x32xf32>
    %c0_36 = arith.constant 0 : index
    %c0_37 = arith.constant 0 : index
    %c0_38 = arith.constant 0 : index
    %53 = vector.load %arg3[%c0_36, %c0_37, %c0_38] : memref<2x1x32xf32, #tpu.memory_space<vmem>>, vector<1x1x32xf32>
    %54 = vector.shape_cast %53 : vector<1x1x32xf32> to vector<1x32xf32>
    %55 = vector.broadcast %54 : vector<1x32xf32> to vector<8x32xf32>
    %56 = arith.addf %52, %55 : vector<8x32xf32>
    %57 = math.tanh %56 : vector<8x32xf32>
    %58 = tpu.concatenate %57, %47 in 1 : vector<8x32xf32>, vector<8x32xf32> -> vector<8x64xf32>
    %c1_39 = arith.constant 1 : index
    %c0_40 = arith.constant 0 : index
    %c0_41 = arith.constant 0 : index
    %59 = vector.load %arg2[%c1_39, %c0_40, %c0_41] : memref<2x64x32xf32, #tpu.memory_space<vmem>>, vector<1x64x32xf32>
    %60 = vector.shape_cast %59 : vector<1x64x32xf32> to vector<64x32xf32>
    %cst_42 = arith.constant dense<0.000000e+00> : vector<8x32xf32>
    %61 = tpu.matmul %58, %60, %cst_42 {dimension_numbers = #tpu.dot_dimension_numbers<[1], [0], [0], [1], [0, 0, 1, 1], [], []>} : vector<8x64xf32>, vector<64x32xf32>, vector<8x32xf32> -> vector<8x32xf32>
    %c1_43 = arith.constant 1 : index
    %c0_44 = arith.constant 0 : index
    %c0_45 = arith.constant 0 : index
    %62 = vector.load %arg3[%c1_43, %c0_44, %c0_45] : memref<2x1x32xf32, #tpu.memory_space<vmem>>, vector<1x1x32xf32>
    %63 = vector.shape_cast %62 : vector<1x1x32xf32> to vector<1x32xf32>
    %64 = vector.broadcast %63 : vector<1x32xf32> to vector<8x32xf32>
    %65 = arith.addf %61, %64 : vector<8x32xf32>
    %66 = math.tanh %65 : vector<8x32xf32>
    %67 = vector.extract_strided_slice %7 {offsets = [24, 0], sizes = [8, 32], strides = [1, 1]} : vector<64x32xf32> to vector<8x32xf32>
    %68 = tpu.concatenate %67, %57 in 1 : vector<8x32xf32>, vector<8x32xf32> -> vector<8x64xf32>
    %c0_46 = arith.constant 0 : index
    %c0_47 = arith.constant 0 : index
    %c0_48 = arith.constant 0 : index
    %69 = vector.load %arg2[%c0_46, %c0_47, %c0_48] : memref<2x64x32xf32, #tpu.memory_space<vmem>>, vector<1x64x32xf32>
    %70 = vector.shape_cast %69 : vector<1x64x32xf32> to vector<64x32xf32>
    %cst_49 = arith.constant dense<0.000000e+00> : vector<8x32xf32>
    %71 = tpu.matmul %68, %70, %cst_49 {dimension_numbers = #tpu.dot_dimension_numbers<[1], [0], [0], [1], [0, 0, 1, 1], [], []>} : vector<8x64xf32>, vector<64x32xf32>, vector<8x32xf32> -> vector<8x32xf32>
    %c0_50 = arith.constant 0 : index
    %c0_51 = arith.constant 0 : index
    %c0_52 = arith.constant 0 : index
    %72 = vector.load %arg3[%c0_50, %c0_51, %c0_52] : memref<2x1x32xf32, #tpu.memory_space<vmem>>, vector<1x1x32xf32>
    %73 = vector.shape_cast %72 : vector<1x1x32xf32> to vector<1x32xf32>
    %74 = vector.broadcast %73 : vector<1x32xf32> to vector<8x32xf32>
    %75 = arith.addf %71, %74 : vector<8x32xf32>
    %76 = math.tanh %75 : vector<8x32xf32>
    %77 = tpu.concatenate %76, %66 in 1 : vector<8x32xf32>, vector<8x32xf32> -> vector<8x64xf32>
    %c1_53 = arith.constant 1 : index
    %c0_54 = arith.constant 0 : index
    %c0_55 = arith.constant 0 : index
    %78 = vector.load %arg2[%c1_53, %c0_54, %c0_55] : memref<2x64x32xf32, #tpu.memory_space<vmem>>, vector<1x64x32xf32>
    %79 = vector.shape_cast %78 : vector<1x64x32xf32> to vector<64x32xf32>
    %cst_56 = arith.constant dense<0.000000e+00> : vector<8x32xf32>
    %80 = tpu.matmul %77, %79, %cst_56 {dimension_numbers = #tpu.dot_dimension_numbers<[1], [0], [0], [1], [0, 0, 1, 1], [], []>} : vector<8x64xf32>, vector<64x32xf32>, vector<8x32xf32> -> vector<8x32xf32>
    %c1_57 = arith.constant 1 : index
    %c0_58 = arith.constant 0 : index
    %c0_59 = arith.constant 0 : index
    %81 = vector.load %arg3[%c1_57, %c0_58, %c0_59] : memref<2x1x32xf32, #tpu.memory_space<vmem>>, vector<1x1x32xf32>
    %82 = vector.shape_cast %81 : vector<1x1x32xf32> to vector<1x32xf32>
    %83 = vector.broadcast %82 : vector<1x32xf32> to vector<8x32xf32>
    %84 = arith.addf %80, %83 : vector<8x32xf32>
    %85 = math.tanh %84 : vector<8x32xf32>
    %86 = vector.extract_strided_slice %7 {offsets = [32, 0], sizes = [8, 32], strides = [1, 1]} : vector<64x32xf32> to vector<8x32xf32>
    %87 = tpu.concatenate %86, %76 in 1 : vector<8x32xf32>, vector<8x32xf32> -> vector<8x64xf32>
    %c0_60 = arith.constant 0 : index
    %c0_61 = arith.constant 0 : index
    %c0_62 = arith.constant 0 : index
    %88 = vector.load %arg2[%c0_60, %c0_61, %c0_62] : memref<2x64x32xf32, #tpu.memory_space<vmem>>, vector<1x64x32xf32>
    %89 = vector.shape_cast %88 : vector<1x64x32xf32> to vector<64x32xf32>
    %cst_63 = arith.constant dense<0.000000e+00> : vector<8x32xf32>
    %90 = tpu.matmul %87, %89, %cst_63 {dimension_numbers = #tpu.dot_dimension_numbers<[1], [0], [0], [1], [0, 0, 1, 1], [], []>} : vector<8x64xf32>, vector<64x32xf32>, vector<8x32xf32> -> vector<8x32xf32>
    %c0_64 = arith.constant 0 : index
    %c0_65 = arith.constant 0 : index
    %c0_66 = arith.constant 0 : index
    %91 = vector.load %arg3[%c0_64, %c0_65, %c0_66] : memref<2x1x32xf32, #tpu.memory_space<vmem>>, vector<1x1x32xf32>
    %92 = vector.shape_cast %91 : vector<1x1x32xf32> to vector<1x32xf32>
    %93 = vector.broadcast %92 : vector<1x32xf32> to vector<8x32xf32>
    %94 = arith.addf %90, %93 : vector<8x32xf32>
    %95 = math.tanh %94 : vector<8x32xf32>
    %96 = tpu.concatenate %95, %85 in 1 : vector<8x32xf32>, vector<8x32xf32> -> vector<8x64xf32>
    %c1_67 = arith.constant 1 : index
    %c0_68 = arith.constant 0 : index
    %c0_69 = arith.constant 0 : index
    %97 = vector.load %arg2[%c1_67, %c0_68, %c0_69] : memref<2x64x32xf32, #tpu.memory_space<vmem>>, vector<1x64x32xf32>
    %98 = vector.shape_cast %97 : vector<1x64x32xf32> to vector<64x32xf32>
    %cst_70 = arith.constant dense<0.000000e+00> : vector<8x32xf32>
    %99 = tpu.matmul %96, %98, %cst_70 {dimension_numbers = #tpu.dot_dimension_numbers<[1], [0], [0], [1], [0, 0, 1, 1], [], []>} : vector<8x64xf32>, vector<64x32xf32>, vector<8x32xf32> -> vector<8x32xf32>
    %c1_71 = arith.constant 1 : index
    %c0_72 = arith.constant 0 : index
    %c0_73 = arith.constant 0 : index
    %100 = vector.load %arg3[%c1_71, %c0_72, %c0_73] : memref<2x1x32xf32, #tpu.memory_space<vmem>>, vector<1x1x32xf32>
    %101 = vector.shape_cast %100 : vector<1x1x32xf32> to vector<1x32xf32>
    %102 = vector.broadcast %101 : vector<1x32xf32> to vector<8x32xf32>
    %103 = arith.addf %99, %102 : vector<8x32xf32>
    %104 = math.tanh %103 : vector<8x32xf32>
    %105 = vector.extract_strided_slice %7 {offsets = [40, 0], sizes = [8, 32], strides = [1, 1]} : vector<64x32xf32> to vector<8x32xf32>
    %106 = tpu.concatenate %105, %95 in 1 : vector<8x32xf32>, vector<8x32xf32> -> vector<8x64xf32>
    %c0_74 = arith.constant 0 : index
    %c0_75 = arith.constant 0 : index
    %c0_76 = arith.constant 0 : index
    %107 = vector.load %arg2[%c0_74, %c0_75, %c0_76] : memref<2x64x32xf32, #tpu.memory_space<vmem>>, vector<1x64x32xf32>
    %108 = vector.shape_cast %107 : vector<1x64x32xf32> to vector<64x32xf32>
    %cst_77 = arith.constant dense<0.000000e+00> : vector<8x32xf32>
    %109 = tpu.matmul %106, %108, %cst_77 {dimension_numbers = #tpu.dot_dimension_numbers<[1], [0], [0], [1], [0, 0, 1, 1], [], []>} : vector<8x64xf32>, vector<64x32xf32>, vector<8x32xf32> -> vector<8x32xf32>
    %c0_78 = arith.constant 0 : index
    %c0_79 = arith.constant 0 : index
    %c0_80 = arith.constant 0 : index
    %110 = vector.load %arg3[%c0_78, %c0_79, %c0_80] : memref<2x1x32xf32, #tpu.memory_space<vmem>>, vector<1x1x32xf32>
    %111 = vector.shape_cast %110 : vector<1x1x32xf32> to vector<1x32xf32>
    %112 = vector.broadcast %111 : vector<1x32xf32> to vector<8x32xf32>
    %113 = arith.addf %109, %112 : vector<8x32xf32>
    %114 = math.tanh %113 : vector<8x32xf32>
    %115 = tpu.concatenate %114, %104 in 1 : vector<8x32xf32>, vector<8x32xf32> -> vector<8x64xf32>
    %c1_81 = arith.constant 1 : index
    %c0_82 = arith.constant 0 : index
    %c0_83 = arith.constant 0 : index
    %116 = vector.load %arg2[%c1_81, %c0_82, %c0_83] : memref<2x64x32xf32, #tpu.memory_space<vmem>>, vector<1x64x32xf32>
    %117 = vector.shape_cast %116 : vector<1x64x32xf32> to vector<64x32xf32>
    %cst_84 = arith.constant dense<0.000000e+00> : vector<8x32xf32>
    %118 = tpu.matmul %115, %117, %cst_84 {dimension_numbers = #tpu.dot_dimension_numbers<[1], [0], [0], [1], [0, 0, 1, 1], [], []>} : vector<8x64xf32>, vector<64x32xf32>, vector<8x32xf32> -> vector<8x32xf32>
    %c1_85 = arith.constant 1 : index
    %c0_86 = arith.constant 0 : index
    %c0_87 = arith.constant 0 : index
    %119 = vector.load %arg3[%c1_85, %c0_86, %c0_87] : memref<2x1x32xf32, #tpu.memory_space<vmem>>, vector<1x1x32xf32>
    %120 = vector.shape_cast %119 : vector<1x1x32xf32> to vector<1x32xf32>
    %121 = vector.broadcast %120 : vector<1x32xf32> to vector<8x32xf32>
    %122 = arith.addf %118, %121 : vector<8x32xf32>
    %123 = math.tanh %122 : vector<8x32xf32>
    %124 = vector.extract_strided_slice %7 {offsets = [48, 0], sizes = [8, 32], strides = [1, 1]} : vector<64x32xf32> to vector<8x32xf32>
    %125 = tpu.concatenate %124, %114 in 1 : vector<8x32xf32>, vector<8x32xf32> -> vector<8x64xf32>
    %c0_88 = arith.constant 0 : index
    %c0_89 = arith.constant 0 : index
    %c0_90 = arith.constant 0 : index
    %126 = vector.load %arg2[%c0_88, %c0_89, %c0_90] : memref<2x64x32xf32, #tpu.memory_space<vmem>>, vector<1x64x32xf32>
    %127 = vector.shape_cast %126 : vector<1x64x32xf32> to vector<64x32xf32>
    %cst_91 = arith.constant dense<0.000000e+00> : vector<8x32xf32>
    %128 = tpu.matmul %125, %127, %cst_91 {dimension_numbers = #tpu.dot_dimension_numbers<[1], [0], [0], [1], [0, 0, 1, 1], [], []>} : vector<8x64xf32>, vector<64x32xf32>, vector<8x32xf32> -> vector<8x32xf32>
    %c0_92 = arith.constant 0 : index
    %c0_93 = arith.constant 0 : index
    %c0_94 = arith.constant 0 : index
    %129 = vector.load %arg3[%c0_92, %c0_93, %c0_94] : memref<2x1x32xf32, #tpu.memory_space<vmem>>, vector<1x1x32xf32>
    %130 = vector.shape_cast %129 : vector<1x1x32xf32> to vector<1x32xf32>
    %131 = vector.broadcast %130 : vector<1x32xf32> to vector<8x32xf32>
    %132 = arith.addf %128, %131 : vector<8x32xf32>
    %133 = math.tanh %132 : vector<8x32xf32>
    %134 = tpu.concatenate %133, %123 in 1 : vector<8x32xf32>, vector<8x32xf32> -> vector<8x64xf32>
    %c1_95 = arith.constant 1 : index
    %c0_96 = arith.constant 0 : index
    %c0_97 = arith.constant 0 : index
    %135 = vector.load %arg2[%c1_95, %c0_96, %c0_97] : memref<2x64x32xf32, #tpu.memory_space<vmem>>, vector<1x64x32xf32>
    %136 = vector.shape_cast %135 : vector<1x64x32xf32> to vector<64x32xf32>
    %cst_98 = arith.constant dense<0.000000e+00> : vector<8x32xf32>
    %137 = tpu.matmul %134, %136, %cst_98 {dimension_numbers = #tpu.dot_dimension_numbers<[1], [0], [0], [1], [0, 0, 1, 1], [], []>} : vector<8x64xf32>, vector<64x32xf32>, vector<8x32xf32> -> vector<8x32xf32>
    %c1_99 = arith.constant 1 : index
    %c0_100 = arith.constant 0 : index
    %c0_101 = arith.constant 0 : index
    %138 = vector.load %arg3[%c1_99, %c0_100, %c0_101] : memref<2x1x32xf32, #tpu.memory_space<vmem>>, vector<1x1x32xf32>
    %139 = vector.shape_cast %138 : vector<1x1x32xf32> to vector<1x32xf32>
    %140 = vector.broadcast %139 : vector<1x32xf32> to vector<8x32xf32>
    %141 = arith.addf %137, %140 : vector<8x32xf32>
    %142 = math.tanh %141 : vector<8x32xf32>
    %143 = vector.extract_strided_slice %7 {offsets = [56, 0], sizes = [8, 32], strides = [1, 1]} : vector<64x32xf32> to vector<8x32xf32>
    %144 = tpu.concatenate %143, %133 in 1 : vector<8x32xf32>, vector<8x32xf32> -> vector<8x64xf32>
    %c0_102 = arith.constant 0 : index
    %c0_103 = arith.constant 0 : index
    %c0_104 = arith.constant 0 : index
    %145 = vector.load %arg2[%c0_102, %c0_103, %c0_104] : memref<2x64x32xf32, #tpu.memory_space<vmem>>, vector<1x64x32xf32>
    %146 = vector.shape_cast %145 : vector<1x64x32xf32> to vector<64x32xf32>
    %cst_105 = arith.constant dense<0.000000e+00> : vector<8x32xf32>
    %147 = tpu.matmul %144, %146, %cst_105 {dimension_numbers = #tpu.dot_dimension_numbers<[1], [0], [0], [1], [0, 0, 1, 1], [], []>} : vector<8x64xf32>, vector<64x32xf32>, vector<8x32xf32> -> vector<8x32xf32>
    %c0_106 = arith.constant 0 : index
    %c0_107 = arith.constant 0 : index
    %c0_108 = arith.constant 0 : index
    %148 = vector.load %arg3[%c0_106, %c0_107, %c0_108] : memref<2x1x32xf32, #tpu.memory_space<vmem>>, vector<1x1x32xf32>
    %149 = vector.shape_cast %148 : vector<1x1x32xf32> to vector<1x32xf32>
    %150 = vector.broadcast %149 : vector<1x32xf32> to vector<8x32xf32>
    %151 = arith.addf %147, %150 : vector<8x32xf32>
    %152 = math.tanh %151 : vector<8x32xf32>
    %153 = tpu.concatenate %152, %142 in 1 : vector<8x32xf32>, vector<8x32xf32> -> vector<8x64xf32>
    %c1_109 = arith.constant 1 : index
    %c0_110 = arith.constant 0 : index
    %c0_111 = arith.constant 0 : index
    %154 = vector.load %arg2[%c1_109, %c0_110, %c0_111] : memref<2x64x32xf32, #tpu.memory_space<vmem>>, vector<1x64x32xf32>
    %155 = vector.shape_cast %154 : vector<1x64x32xf32> to vector<64x32xf32>
    %cst_112 = arith.constant dense<0.000000e+00> : vector<8x32xf32>
    %156 = tpu.matmul %153, %155, %cst_112 {dimension_numbers = #tpu.dot_dimension_numbers<[1], [0], [0], [1], [0, 0, 1, 1], [], []>} : vector<8x64xf32>, vector<64x32xf32>, vector<8x32xf32> -> vector<8x32xf32>
    %c1_113 = arith.constant 1 : index
    %c0_114 = arith.constant 0 : index
    %c0_115 = arith.constant 0 : index
    %157 = vector.load %arg3[%c1_113, %c0_114, %c0_115] : memref<2x1x32xf32, #tpu.memory_space<vmem>>, vector<1x1x32xf32>
    %158 = vector.shape_cast %157 : vector<1x1x32xf32> to vector<1x32xf32>
    %159 = vector.broadcast %158 : vector<1x32xf32> to vector<8x32xf32>
    %160 = arith.addf %156, %159 : vector<8x32xf32>
    %161 = math.tanh %160 : vector<8x32xf32>
    %c0_116 = arith.constant 0 : index
    %c0_117 = arith.constant 0 : index
    %162 = vector.load %arg4[%c0_116, %c0_117] : memref<32x128xf32, #tpu.memory_space<vmem>>, vector<32x128xf32>
    %cst_118 = arith.constant dense<0.000000e+00> : vector<8x128xf32>
    %163 = tpu.matmul %161, %162, %cst_118 {dimension_numbers = #tpu.dot_dimension_numbers<[1], [0], [0], [1], [0, 0, 1, 1], [], []>} : vector<8x32xf32>, vector<32x128xf32>, vector<8x128xf32> -> vector<8x128xf32>
    %c0_119 = arith.constant 0 : index
    %c0_120 = arith.constant 0 : index
    %164 = vector.load %arg5[%c0_119, %c0_120] : memref<1x128xf32, #tpu.memory_space<vmem>>, vector<1x128xf32>
    %165 = vector.broadcast %164 : vector<1x128xf32> to vector<8x128xf32>
    %166 = arith.addf %163, %165 : vector<8x128xf32>
    %cst_121 = arith.constant dense<0xFF800000> : vector<8xf32>
    %167 = vector.multi_reduction <maximumf>, %166, %cst_121 [1] : vector<8x128xf32> to vector<8xf32>
    %168 = vector.shape_cast %167 : vector<8xf32> to vector<8x1xf32>
    %169 = vector.broadcast %168 : vector<8x1xf32> to vector<8x128xf32>
    %170 = arith.subf %166, %169 : vector<8x128xf32>
    %171 = math.exp %170 : vector<8x128xf32>
    %cst_122 = arith.constant dense<0.000000e+00> : vector<8xf32>
    %172 = vector.multi_reduction <add>, %171, %cst_122 [1] : vector<8x128xf32> to vector<8xf32>
    %173 = vector.shape_cast %172 : vector<8xf32> to vector<8x1xf32>
    %174 = tpu.reciprocal %173 {approx = true} : vector<8x1xf32> -> vector<8x1xf32>
    %175 = arith.mulf %173, %174 : vector<8x1xf32>
    %cst_123 = arith.constant 2.000000e+00 : f32
    %176 = vector.broadcast %cst_123 : f32 to vector<8x1xf32>
    %177 = arith.subf %176, %175 : vector<8x1xf32>
    %178 = arith.mulf %174, %177 : vector<8x1xf32>
    %179 = vector.broadcast %178 : vector<8x1xf32> to vector<8x128xf32>
    %180 = arith.mulf %171, %179 : vector<8x128xf32>
    %c0_124 = arith.constant 0 : index
    %c0_125 = arith.constant 0 : index
    %181 = vector.load %arg6[%c0_124, %c0_125] : memref<8x128xf32, #tpu.memory_space<vmem>>, vector<8x128xf32>
    tpu.vector_store %arg6[%c0_124, %c0_125], %180 {strides = array<i32>} : memref<8x128xf32, #tpu.memory_space<vmem>>, vector<8x128xf32>,
    return
  }
}

</mosaic_0001>

<bundles_post_ra>
// kernel: torch_model_forward.1
= control target key start
LH: loop header
LB: loop body
LE: loop exit
PB: predicated region body
PF: predicated region fallthrough
CT: control target
= control target key end

     0   :  { %v2404_v0 = vmov 0   ;;  %vm110_vm0 = vcmask 1045504   ;;  %vm2405_vm1 = vmmov 1   ;;  %v2406_v14 = vmov 0.0|0.0   ;;  %s2831_s0 = inlined_call_operand.vmem [shape: s32[64,1], index: 0, kind: input, shape index: {}]   ;;  %s2832_s1 = inlined_call_operand.vmem [shape: f32[30,32], index: 1, kind: input, shape index: {}]   ;;  %s2833_s2 = inlined_call_operand.vmem [shape: f32[2,64,32], index: 2, kind: input, shape index: {}]   ;;  %s2834_s3 = inlined_call_operand.vmem [shape: f32[2,1,32], index: 3, kind: input, shape index: {}]   ;;  %s2835_s4 = inlined_call_operand.vmem [shape: f32[32,128], index: 4, kind: input, shape index: {}]   ;;  %s2836_s5 = inlined_call_operand.vmem [shape: f32[1,128], index: 5, kind: input, shape index: {}]   ;;  %s2837_s6 = inlined_call_operand.vmem [shape: f32[8,128], index: 6, kind: output, shape index: {}]  }
   0x1   :  { %2366 = vset.pattern.permute.xlu0 %v2404_v0  ;;  %v23_v1 = vld [vmem:[%s2831_s0] sm:$0xff]  ;;  %2367 = vset.pattern.permute.xlu1 %v2404_v0  ;;  %v25_v2 = vld [vmem:[%s2831_s0 + $0x10] sm:$0xff]  ;;  %v24_v3 = vld [vmem:[%s2831_s0 + $0x8] sm:$0xff]  ;;  %v31_v24 = vlaneseq  ;;  %vm85_vm3 = vcmask 244736   ;;  %v2407_v28 = vmov 0.0   ;;  %vm2408_vm11 = vmmov 0  }
   0x2   :  { %34 = vperm.xlu0 %2366, %v23_v1   ;;  %40 = vperm.xlu1 %2367, %v25_v2   ;;  %v26_v4 = vld [vmem:[%s2831_s0 + $0x18] sm:$0xff]  ;;  %v81_v5 = vld [vmem:[%s2832_s1] sm:$0xff]  ;;  %v82_v6 = vld [vmem:[%s2832_s1 + $0x8] sm:$0xff]  ;;  %vm219_vm12 = vcmask 261120   ;;  %vm236_vm13 = vcmask 523264  }
   0x3   :  { %v2152_v7 = vpack.c.bf16 %v82_v6, %v81_v5  ;;  %v83_v8 = vld [vmem:[%s2832_s1 + $0x10] sm:$0xff]  ;;  %v84_v9 = vld [vmem:[%s2832_s1 + $0x18] sm:$0x3f]  ;;  %vm2157_vm2 = vmpackc.low %vm110_vm0, %vm2405_vm1  ;;  %2162 = vmatprep.subr.bf16.mxu1 %v2406_v14  ;;  %v32_v25 = vand.u32 127, %v31_v24  ;;  %1853 = vmatprep.mubr.msk.f32.mxu1 %vm2408_vm11, %v2407_v28 }
   0x4   :  { %v2156_v10 = vpack.c.bf16 %v84_v9, %v83_v8  ;;  %v27_v11 = vld [vmem:[%s2831_s0 + $0x20] sm:$0xff]  ;;  %v28_v12 = vld [vmem:[%s2831_s0 + $0x28] sm:$0xff]  ;;  %v29_v13 = vld [vmem:[%s2831_s0 + $0x30] sm:$0xff] }
   0x5   :  { %2153 = vmatprep.subr.bf16.mxu0 %v2152_v7  ;;  %v221_v15 = vld [vmem:[%s2833_s2] sm:$0xff]  ;;  %v222_v16 = vld [vmem:[%s2833_s2 + $0x8] sm:$0xff]  ;;  %v223_v17 = vld [vmem:[%s2833_s2 + $0x10] sm:$0xff] }
   0x6   :  { %37 = vperm.xlu0 %2366, %v24_v3   ;;  %43 = vperm.xlu1 %2367, %v26_v4   ;;  %v2489_v18 = vpack.c.bf16 %v222_v16, %v221_v15  ;;  %v224_v19 = vld [vmem:[%s2833_s2 + $0x18] sm:$0xff]  ;;  %v225_v21 = vld [vmem:[%s2833_s2 + $0x20] sm:$0xff]  ;;  %v226_v22 = vld [vmem:[%s2833_s2 + $0x28] sm:$0xff] }
   0x7   :  { %2155 = vmatpush3.bf16.msra.mxu0 %v2152_v7  ;;  %v2495_v20 = vpack.c.bf16 %v224_v19, %v223_v17  ;;  %v2505_v23 = vpack.c.bf16 %v226_v22, %v225_v21  ;;  %v227_v41 = vld [vmem:[%s2833_s2 + $0x30] sm:$0xff]  ;;  %v228_v42 = vld [vmem:[%s2833_s2 + $0x38] sm:$0xff]  ;;  %v1629_v45 = vld [vmem:[%s2833_s2 + $0x40] sm:$0xff] }
   0x8   :  { %2158 = vmatprep.subr.msk.bf16.mxu0 %vm2157_vm2, %v2156_v10  ;;  %2164 = vmatpush3.bf16.msra.mxu1 %v2489_v18  ;;  %v2530_v43 = vpack.c.bf16 %v228_v42, %v227_v41  ;;  %v30_v44 = vld [vmem:[%s2831_s0 + $0x38] sm:$0xff]  ;;  %v1630_v46 = vld [vmem:[%s2833_s2 + $0x48] sm:$0xff]  ;;  %v1631_v53 = vld [vmem:[%s2833_s2 + $0x50] sm:$0xff] }
   0x9   :  { %2165 = vmatprep.subr.bf16.mxu1 %v2406_v14  ;;  %v2545_v47 = vpack.c.bf16 %v1630_v46, %v1629_v45  ;;  %v1632_v54 = vld [vmem:[%s2833_s2 + $0x58] sm:$0xff]  ;;  %v1633_v56 = vld [vmem:[%s2833_s2 + $0x60] sm:$0xff]  ;;  %v1634_v57 = vld [vmem:[%s2833_s2 + $0x68] sm:$0xff] }
   0xa   :  { %46 = vperm.xlu0 %2366, %v27_v11   ;;  %49 = vperm.xlu1 %2367, %v28_v12   ;;  %v2571_v55 = vpack.c.bf16 %v1632_v54, %v1631_v53  ;;  %v2580_v58 = vpack.c.bf16 %v1634_v57, %v1633_v56  ;;  %v1635_v59 = vld [vmem:[%s2833_s2 + $0x70] sm:$0xff]  ;;  %v1636_v60 = vld [vmem:[%s2833_s2 + $0x78] sm:$0xff]  ;;  %v2598_v62 = vld [vmem:[%s2834_s3] ss:$0 sm:$0xff]  ;;  %s2409_s2 = smov 32  }
   0xb   :  { %2161 = vmatpush3.bf16.msk.msra.mxu0 %vm2157_vm2, %v2156_v10  ;;  %v2590_v61 = vpack.c.bf16 %v1636_v60, %v1635_v59  ;;  %v2639_v12 = vld [vmem:[%s2834_s3 + $0x1] ss:$0 sm:$0xff] }
   0xc   :  { %2174 = vmatprep.subr.bf16.mxu0 %v2406_v14  ;;  %2167 = vmatpush3.bf16.msra.mxu1 %v2495_v20 }
   0xd   :  { %2168 = vmatprep.subr.bf16.mxu1 %v2406_v14 }
   0xe   :  { %52 = vperm.xlu0 %2366, %v29_v13   ;;  %55 = vperm.xlu1 %2367, %v30_v44  }
  0x10   :  { %2170 = vmatpush3.bf16.msra.mxu1 %v2505_v23 }
  0x11   :  { %2171 = vmatprep.subr.bf16.mxu1 %v2406_v14 }
  0x14   :  { %2173 = vmatpush3.bf16.msra.mxu1 %v2530_v43 }
  0x15   :  { %2186 = vmatprep.subr.bf16.mxu1 %v2406_v14 }
  0x81   :  { %v35_v26 = vpop.permute.xlu0 %34  ;;  %v41_v27 = vpop.permute.xlu1 %40 }
  0x82   :  { %vm57_vm4 = vcmp.eq.s32.totalorder %v32_v25, %v35_v26  ;;  %vm59_vm5 = vcmp.eq.s32.totalorder %v32_v25, %v41_v27 }
  0x83   :  { %v1610_v29 = vsel %vm57_vm4, 1.0, %v2407_v28  ;;  %v1612_v32 = vsel %vm59_vm5, 1.0, %v2407_v28 }
  0x84   :  { %1825 = vmatprep.mubr.msk.f32.mxu0 %vm85_vm3, %v1610_v29 }
  0x85   :  { %v38_v30 = vpop.permute.xlu0 %37  ;;  %v44_v31 = vpop.permute.xlu1 %43 }
  0x86   :  { %vm58_vm6 = vcmp.eq.s32.totalorder %v32_v25, %v38_v30  ;;  %vm60_vm7 = vcmp.eq.s32.totalorder %v32_v25, %v44_v31 }
  0x87   :  { %v1611_v33 = vsel %vm58_vm6, 1.0, %v2407_v28  ;;  %v1613_v34 = vsel %vm60_vm7, 1.0, %v2407_v28 }
  0x88   :  { %1826 = vmatmul.mubr.msk.f32.vlgmr.msra.gmra.mrb[0].mxu0 %vm85_vm3, %v1611_v33 }
  0x89   :  { %v47_v35 = vpop.permute.xlu0 %46  ;;  %1828 = vmatprep.mubr.msk.f32.mxu0 %vm85_vm3, %v1612_v32  ;;  %v50_v36 = vpop.permute.xlu1 %49  ;;  %2176 = vmatpush3.bf16.msra.mxu0 %v2545_v47 }
  0x8a   :  { %vm61_vm8 = vcmp.eq.s32.totalorder %v32_v25, %v47_v35  ;;  %vm62_vm9 = vcmp.eq.s32.totalorder %v32_v25, %v50_v36  ;;  %2177 = vmatprep.subr.bf16.mxu0 %v2406_v14 }
  0x8b   :  { %v1614_v37 = vsel %vm61_vm8, 1.0, %v2407_v28  ;;  %v1615_v38 = vsel %vm62_vm9, 1.0, %v2407_v28 }
  0x8c   :  { %1829 = vmatmul.mubr.msk.f32.gmra.mrb[2].mxu0 %vm85_vm3, %v1613_v34 }
  0x8d   :  { %1831 = vmatprep.mubr.msk.f32.mxu0 %vm85_vm3, %v1614_v37  ;;  %v53_v39 = vpop.permute.xlu0 %52  ;;  %v56_v51 = vpop.permute.xlu1 %55  ;;  %2179 = vmatpush3.bf16.msra.mxu0 %v2571_v55 }
  0x8e   :  { %vm63_vm10 = vcmp.eq.s32.totalorder %v32_v25, %v53_v39  ;;  %vm64_vm14 = vcmp.eq.s32.totalorder %v32_v25, %v56_v51  ;;  %2180 = vmatprep.subr.bf16.mxu0 %v2406_v14 }
  0x8f   :  { %v1616_v40 = vsel %vm63_vm10, 1.0, %v2407_v28  ;;  %v1617_v52 = vsel %vm64_vm14, 1.0, %v2407_v28 }
  0x90   :  { %1832 = vmatmul.mubr.msk.f32.gmra.mrb[4].mxu0 %vm85_vm3, %v1615_v38 }
  0x91   :  { %1834 = vmatprep.mubr.msk.f32.mxu0 %vm85_vm3, %v1616_v40  ;;  %2182 = vmatpush3.bf16.msra.mxu0 %v2580_v58 }
  0x92   :  { %2183 = vmatprep.subr.bf16.mxu0 %v2406_v14 }
  0x94   :  { %1835 = vmatmul.mubr.msk.f32.gmra.mrb[6].mxu0 %vm85_vm3, %v1617_v52 }
  0x95   :  { %1872 = vmatprep.mubr.msk.f32.mxu0 %vm2408_vm11, %v2407_v28  ;;  %2185 = vmatpush3.bf16.msra.mxu0 %v2590_v61 }
  0x96   :  { %2198 = vmatprep.subr.bf16.mxu0 %v2406_v14 }
 0x15b   :  { %v1827_v48 = vpop.f32.mrb[0].mxu0 }
 0x15c   :  { %v180_v49 = vpop.f32.mrb[1].mxu0 }
 0x15d   :  { %v220_v50 = vsel %vm219_vm12, %v180_v49, 0.0 }
 0x15e   :  { %1854 = vmatmul.mubr.msk.f32.vlgmr.msra.gmra.mrb[0].mxu1 %vm236_vm13, %v220_v50 }
 0x15f   :  { %2188 = vmatpush3.bf16.msra.mxu1 %v2489_v18  ;;  %1891 = vmatprep.mubr.msk.f32.mxu1 %vm2408_vm11, %v2407_v28  ;;  %v2601_v2 = vpop.f32.mrb[2].mxu0 }
 0x160   :  { %2189 = vmatprep.subr.bf16.mxu1 %v2406_v14  ;;  %v190_v3 = vpop.f32.mrb[3].mxu0 }
 0x163   :  { %2191 = vmatpush3.bf16.msra.mxu1 %v2495_v20  ;;  %v2603_v4 = vpop.f32.mrb[4].mxu0 }
 0x164   :  { %2192 = vmatprep.subr.bf16.mxu1 %v2406_v14  ;;  %v2605_v5 = vpop.f32.mrb[5].mxu0 }
 0x167   :  { %2194 = vmatpush3.bf16.msra.mxu1 %v2505_v23  ;;  %v2607_v6 = vpop.f32.mrb[6].mxu0 }
 0x168   :  { %2195 = vmatprep.subr.bf16.mxu1 %v2406_v14  ;;  %v2609_v7 = vpop.f32.mrb[7].mxu0 }
 0x16b   :  { %2197 = vmatpush3.bf16.msra.mxu1 %v2530_v43 }
 0x16c   :  { %2210 = vmatprep.subr.bf16.mxu1 %v2406_v14 }
 0x231   :  { %v306_v63 = vpop.f32.mrb[0].mxu1 }
 0x232   :  { %v307_v0 = vadd.f32 %v2598_v62, %v306_v63  ;;  %v1855_v1 = vpop.f32.mrb[1].mxu1 }
 0x234   :  { %2368 = vtanh.f32 %v307_v0 }
 0x23e   :  { %v2369_v8 = vpop.eup %2368 }
 0x23f   :  { %404 = vrot.lane.b32.xlu0 %v2369_v8, %s2409_s2  ;;  %v311_v9 = vsel %vm219_vm12, %v2369_v8, 0.0 }
 0x240   :  { %1873 = vmatmul.mubr.msk.f32.vlgmr.msra.gmra.mrb[8].mxu0 %vm236_vm13, %v311_v9 }
 0x241   :  { %2200 = vmatpush3.bf16.msra.mxu0 %v2545_v47  ;;  %1910 = vmatprep.mubr.msk.f32.mxu0 %vm2408_vm11, %v2407_v28 }
 0x242   :  { %2201 = vmatprep.subr.bf16.mxu0 %v2406_v14 }
 0x245   :  { %2203 = vmatpush3.bf16.msra.mxu0 %v2571_v55 }
 0x246   :  { %2204 = vmatprep.subr.bf16.mxu0 %v2406_v14 }
 0x249   :  { %2206 = vmatpush3.bf16.msra.mxu0 %v2580_v58 }
 0x24a   :  { %2207 = vmatprep.subr.bf16.mxu0 %v2406_v14 }
 0x24d   :  { %2209 = vmatpush3.bf16.msra.mxu0 %v2590_v61 }
 0x24e   :  { %2222 = vmatprep.subr.bf16.mxu0 %v2406_v14 }
 0x2b1   :  { %v405_v10 = vpop.permute.xlu0 %404 }
 0x2b2   :  { %v407_v11 = vsel %vm219_vm12, %v1827_v48, %v405_v10 }
 0x2b3   :  { %1892 = vmatmul.mubr.msk.f32.vlgmr.msra.gmra.mrb[2].mxu1 %vm236_vm13, %v407_v11 }
 0x2b4   :  { %2212 = vmatpush3.bf16.msra.mxu1 %v2489_v18  ;;  %1929 = vmatprep.mubr.msk.f32.mxu1 %vm2408_vm11, %v2407_v28 }
 0x2b5   :  { %2213 = vmatprep.subr.bf16.mxu1 %v2406_v14 }
 0x2b8   :  { %2215 = vmatpush3.bf16.msra.mxu1 %v2495_v20 }
 0x2b9   :  { %2216 = vmatprep.subr.bf16.mxu1 %v2406_v14 }
 0x2bc   :  { %2218 = vmatpush3.bf16.msra.mxu1 %v2505_v23 }
 0x2bd   :  { %2219 = vmatprep.subr.bf16.mxu1 %v2406_v14 }
 0x2c0   :  { %2221 = vmatpush3.bf16.msra.mxu1 %v2530_v43 }
 0x2c1   :  { %2234 = vmatprep.subr.bf16.mxu1 %v2406_v14 }
 0x313   :  { %v398_v13 = vpop.f32.mrb[8].mxu0 }
 0x314   :  { %v399_v15 = vadd.f32 %v2639_v12, %v398_v13  ;;  %v1874_v16 = vpop.f32.mrb[9].mxu0 }
 0x316   :  { %2370 = vtanh.f32 %v399_v15 }
 0x320   :  { %v2371_v17 = vpop.eup %2370 }
 0x321   :  { %483 = vrot.lane.b32.xlu1 %v2371_v17, %s2409_s2 }
 0x386   :  { %v477_v19 = vpop.f32.mrb[2].mxu1 }
 0x387   :  { %v478_v21 = vadd.f32 %v2598_v62, %v477_v19  ;;  %v1893_v22 = vpop.f32.mrb[3].mxu1 }
 0x389   :  { %2372 = vtanh.f32 %v478_v21 }
 0x393   :  { %v2373_v24 = vpop.eup %2372  ;;  %v484_v25 = vpop.permute.xlu1 %483 }
 0x394   :  { %v486_v26 = vsel %vm219_vm12, %v2373_v24, %v484_v25  ;;  %562 = vrot.lane.b32.xlu0 %v2373_v24, %s2409_s2 }
 0x395   :  { %1911 = vmatmul.mubr.msk.f32.vlgmr.msra.gmra.mrb[10].mxu0 %vm236_vm13, %v486_v26 }
 0x396   :  { %2224 = vmatpush3.bf16.msra.mxu0 %v2545_v47  ;;  %1948 = vmatprep.mubr.msk.f32.mxu0 %vm2408_vm11, %v2407_v28 }
 0x397   :  { %2225 = vmatprep.subr.bf16.mxu0 %v2406_v14 }
 0x39a   :  { %2227 = vmatpush3.bf16.msra.mxu0 %v2571_v55 }
 0x39b   :  { %2228 = vmatprep.subr.bf16.mxu0 %v2406_v14 }
 0x39e   :  { %2230 = vmatpush3.bf16.msra.mxu0 %v2580_v58 }
 0x39f   :  { %2231 = vmatprep.subr.bf16.mxu0 %v2406_v14 }
 0x3a2   :  { %2233 = vmatpush3.bf16.msra.mxu0 %v2590_v61 }
 0x3a3   :  { %2246 = vmatprep.subr.bf16.mxu0 %v2406_v14 }
 0x406   :  { %v563_v27 = vpop.permute.xlu0 %562 }
 0x407   :  { %v565_v29 = vsel %vm219_vm12, %v190_v3, %v563_v27 }
 0x408   :  { %1930 = vmatmul.mubr.msk.f32.vlgmr.msra.gmra.mrb[4].mxu1 %vm236_vm13, %v565_v29 }
 0x409   :  { %2236 = vmatpush3.bf16.msra.mxu1 %v2489_v18  ;;  %1967 = vmatprep.mubr.msk.f32.mxu1 %vm2408_vm11, %v2407_v28 }
 0x40a   :  { %2237 = vmatprep.subr.bf16.mxu1 %v2406_v14 }
 0x40d   :  { %2239 = vmatpush3.bf16.msra.mxu1 %v2495_v20 }
 0x40e   :  { %2240 = vmatprep.subr.bf16.mxu1 %v2406_v14 }
 0x411   :  { %2242 = vmatpush3.bf16.msra.mxu1 %v2505_v23 }
 0x412   :  { %2243 = vmatprep.subr.bf16.mxu1 %v2406_v14 }
 0x415   :  { %2245 = vmatpush3.bf16.msra.mxu1 %v2530_v43 }
 0x416   :  { %2258 = vmatprep.subr.bf16.mxu1 %v2406_v14 }
 0x468   :  { %v556_v30 = vpop.f32.mrb[10].mxu0 }
 0x469   :  { %v557_v31 = vadd.f32 %v2639_v12, %v556_v30  ;;  %v1912_v32 = vpop.f32.mrb[11].mxu0 }
 0x46b   :  { %2374 = vtanh.f32 %v557_v31 }
 0x475   :  { %v2375_v33 = vpop.eup %2374 }
 0x476   :  { %641 = vrot.lane.b32.xlu1 %v2375_v33, %s2409_s2 }
 0x4db   :  { %v635_v34 = vpop.f32.mrb[4].mxu1 }
 0x4dc   :  { %v636_v35 = vadd.f32 %v2598_v62, %v635_v34  ;;  %v1931_v36 = vpop.f32.mrb[5].mxu1 }
 0x4de   :  { %2376 = vtanh.f32 %v636_v35 }
 0x4e8   :  { %v2377_v37 = vpop.eup %2376  ;;  %v642_v38 = vpop.permute.xlu1 %641 }
 0x4e9   :  { %v644_v39 = vsel %vm219_vm12, %v2377_v37, %v642_v38  ;;  %720 = vrot.lane.b32.xlu0 %v2377_v37, %s2409_s2 }
 0x4ea   :  { %1949 = vmatmul.mubr.msk.f32.vlgmr.msra.gmra.mrb[12].mxu0 %vm236_vm13, %v644_v39 }
 0x4eb   :  { %2248 = vmatpush3.bf16.msra.mxu0 %v2545_v47  ;;  %1986 = vmatprep.mubr.msk.f32.mxu0 %vm2408_vm11, %v2407_v28 }
 0x4ec   :  { %2249 = vmatprep.subr.bf16.mxu0 %v2406_v14 }
 0x4ef   :  { %2251 = vmatpush3.bf16.msra.mxu0 %v2571_v55 }
 0x4f0   :  { %2252 = vmatprep.subr.bf16.mxu0 %v2406_v14 }
 0x4f3   :  { %2254 = vmatpush3.bf16.msra.mxu0 %v2580_v58 }
 0x4f4   :  { %2255 = vmatprep.subr.bf16.mxu0 %v2406_v14 }
 0x4f7   :  { %2257 = vmatpush3.bf16.msra.mxu0 %v2590_v61 }
 0x4f8   :  { %2270 = vmatprep.subr.bf16.mxu0 %v2406_v14 }
 0x55b   :  { %v721_v40 = vpop.permute.xlu0 %720 }
 0x55c   :  { %v723_v41 = vsel %vm219_vm12, %v2601_v2, %v721_v40  ;;  %v1510_v40 = vld [vmem:[%s2835_s4 + $0x8] sm:$0xff] }
 0x55d   :  { %1968 = vmatmul.mubr.msk.f32.vlgmr.msra.gmra.mrb[6].mxu1 %vm236_vm13, %v723_v41 }
 0x55e   :  { %2260 = vmatpush3.bf16.msra.mxu1 %v2489_v18  ;;  %2005 = vmatprep.mubr.msk.f32.mxu1 %vm2408_vm11, %v2407_v28 }
 0x55f   :  { %2261 = vmatprep.subr.bf16.mxu1 %v2406_v14 }
 0x562   :  { %2263 = vmatpush3.bf16.msra.mxu1 %v2495_v20 }
 0x563   :  { %2264 = vmatprep.subr.bf16.mxu1 %v2406_v14 }
 0x566   :  { %2266 = vmatpush3.bf16.msra.mxu1 %v2505_v23 }
 0x567   :  { %2267 = vmatprep.subr.bf16.mxu1 %v2406_v14 }
 0x56a   :  { %2269 = vmatpush3.bf16.msra.mxu1 %v2530_v43 }
 0x56b   :  { %2282 = vmatprep.subr.bf16.mxu1 %v2406_v14 }
 0x5bd   :  { %v714_v42 = vpop.f32.mrb[12].mxu0 }
 0x5be   :  { %v715_v44 = vadd.f32 %v2639_v12, %v714_v42  ;;  %v1950_v45 = vpop.f32.mrb[13].mxu0  ;;  %v1512_v42 = vld [vmem:[%s2835_s4 + $0x18] sm:$0xff] }
 0x5c0   :  { %2378 = vtanh.f32 %v715_v44 }
 0x5ca   :  { %v2379_v46 = vpop.eup %2378 }
 0x5cb   :  { %799 = vrot.lane.b32.xlu1 %v2379_v46, %s2409_s2 }
 0x630   :  { %v793_v48 = vpop.f32.mrb[6].mxu1 }
 0x631   :  { %v794_v49 = vadd.f32 %v2598_v62, %v793_v48  ;;  %v1969_v50 = vpop.f32.mrb[7].mxu1 }
 0x632   :  { %v1654_v50 = vld [vmem:[%s2836_s5] ss:$0 sm:$0xff] }
 0x633   :  { %2380 = vtanh.f32 %v794_v49 }
 0x63d   :  { %v2381_v51 = vpop.eup %2380  ;;  %v800_v52 = vpop.permute.xlu1 %799 }
 0x63e   :  { %v802_v53 = vsel %vm219_vm12, %v2381_v51, %v800_v52  ;;  %878 = vrot.lane.b32.xlu0 %v2381_v51, %s2409_s2 }
 0x63f   :  { %1987 = vmatmul.mubr.msk.f32.vlgmr.msra.gmra.mrb[14].mxu0 %vm236_vm13, %v802_v53 }
 0x640   :  { %2272 = vmatpush3.bf16.msra.mxu0 %v2545_v47  ;;  %2024 = vmatprep.mubr.msk.f32.mxu0 %vm2408_vm11, %v2407_v28 }
 0x641   :  { %2273 = vmatprep.subr.bf16.mxu0 %v2406_v14 }
 0x644   :  { %2275 = vmatpush3.bf16.msra.mxu0 %v2571_v55 }
 0x645   :  { %2276 = vmatprep.subr.bf16.mxu0 %v2406_v14 }
 0x648   :  { %2278 = vmatpush3.bf16.msra.mxu0 %v2580_v58 }
 0x649   :  { %2279 = vmatprep.subr.bf16.mxu0 %v2406_v14 }
 0x64c   :  { %2281 = vmatpush3.bf16.msra.mxu0 %v2590_v61 }
 0x64d   :  { %2294 = vmatprep.subr.bf16.mxu0 %v2406_v14 }
 0x6b0   :  { %v879_v54 = vpop.permute.xlu0 %878 }
 0x6b1   :  { %v881_v56 = vsel %vm219_vm12, %v2605_v5, %v879_v54 }
 0x6b2   :  { %2006 = vmatmul.mubr.msk.f32.vlgmr.msra.gmra.mrb[8].mxu1 %vm236_vm13, %v881_v56 }
 0x6b3   :  { %2284 = vmatpush3.bf16.msra.mxu1 %v2489_v18  ;;  %2043 = vmatprep.mubr.msk.f32.mxu1 %vm2408_vm11, %v2407_v28 }
 0x6b4   :  { %2285 = vmatprep.subr.bf16.mxu1 %v2406_v14 }
 0x6b7   :  { %2287 = vmatpush3.bf16.msra.mxu1 %v2495_v20 }
 0x6b8   :  { %2288 = vmatprep.subr.bf16.mxu1 %v2406_v14 }
 0x6bb   :  { %2290 = vmatpush3.bf16.msra.mxu1 %v2505_v23 }
 0x6bc   :  { %2291 = vmatprep.subr.bf16.mxu1 %v2406_v14 }
 0x6bf   :  { %2293 = vmatpush3.bf16.msra.mxu1 %v2530_v43 }
 0x6c0   :  { %2306 = vmatprep.subr.bf16.mxu1 %v2406_v14 }
 0x712   :  { %v872_v57 = vpop.f32.mrb[14].mxu0 }
 0x713   :  { %v873_v59 = vadd.f32 %v2639_v12, %v872_v57  ;;  %v1988_v60 = vpop.f32.mrb[15].mxu0 }
 0x715   :  { %2382 = vtanh.f32 %v873_v59 }
 0x71f   :  { %v2383_v63 = vpop.eup %2382 }
 0x720   :  { %957 = vrot.lane.b32.xlu1 %v2383_v63, %s2409_s2 }
 0x785   :  { %v951_v0 = vpop.f32.mrb[8].mxu1 }
 0x786   :  { %v952_v1 = vadd.f32 %v2598_v62, %v951_v0  ;;  %v2007_v2 = vpop.f32.mrb[9].mxu1 }
 0x788   :  { %2384 = vtanh.f32 %v952_v1 }
 0x792   :  { %v2385_v3 = vpop.eup %2384  ;;  %v958_v5 = vpop.permute.xlu1 %957 }
 0x793   :  { %v960_v8 = vsel %vm219_vm12, %v2385_v3, %v958_v5  ;;  %1036 = vrot.lane.b32.xlu0 %v2385_v3, %s2409_s2 }
 0x794   :  { %2025 = vmatmul.mubr.msk.f32.vlgmr.msra.gmra.mrb[16].mxu0 %vm236_vm13, %v960_v8 }
 0x795   :  { %2296 = vmatpush3.bf16.msra.mxu0 %v2545_v47  ;;  %2062 = vmatprep.mubr.msk.f32.mxu0 %vm2408_vm11, %v2407_v28 }
 0x796   :  { %2297 = vmatprep.subr.bf16.mxu0 %v2406_v14 }
 0x799   :  { %2299 = vmatpush3.bf16.msra.mxu0 %v2571_v55 }
 0x79a   :  { %2300 = vmatprep.subr.bf16.mxu0 %v2406_v14 }
 0x79d   :  { %2302 = vmatpush3.bf16.msra.mxu0 %v2580_v58 }
 0x79e   :  { %2303 = vmatprep.subr.bf16.mxu0 %v2406_v14 }
 0x7a1   :  { %2305 = vmatpush3.bf16.msra.mxu0 %v2590_v61 }
 0x7a2   :  { %2318 = vmatprep.subr.bf16.mxu0 %v2406_v14 }
 0x805   :  { %v1037_v9 = vpop.permute.xlu0 %1036 }
 0x806   :  { %v1039_v10 = vsel %vm219_vm12, %v2603_v4, %v1037_v9 }
 0x807   :  { %2044 = vmatmul.mubr.msk.f32.vlgmr.msra.gmra.mrb[10].mxu1 %vm236_vm13, %v1039_v10 }
 0x808   :  { %2308 = vmatpush3.bf16.msra.mxu1 %v2489_v18  ;;  %2081 = vmatprep.mubr.msk.f32.mxu1 %vm2408_vm11, %v2407_v28 }
 0x809   :  { %2309 = vmatprep.subr.bf16.mxu1 %v2406_v14 }
 0x80c   :  { %2311 = vmatpush3.bf16.msra.mxu1 %v2495_v20 }
 0x80d   :  { %2312 = vmatprep.subr.bf16.mxu1 %v2406_v14 }
 0x810   :  { %2314 = vmatpush3.bf16.msra.mxu1 %v2505_v23 }
 0x811   :  { %2315 = vmatprep.subr.bf16.mxu1 %v2406_v14 }
 0x814   :  { %2317 = vmatpush3.bf16.msra.mxu1 %v2530_v43 }
 0x815   :  { %2330 = vmatprep.subr.bf16.mxu1 %v2406_v14 }
 0x867   :  { %v1030_v4 = vpop.f32.mrb[16].mxu0 }
 0x868   :  { %v1031_v11 = vadd.f32 %v2639_v12, %v1030_v4  ;;  %v2026_v13 = vpop.f32.mrb[17].mxu0 }
 0x86a   :  { %2386 = vtanh.f32 %v1031_v11 }
 0x874   :  { %v2387_v15 = vpop.eup %2386 }
 0x875   :  { %1115 = vrot.lane.b32.xlu1 %v2387_v15, %s2409_s2 }
 0x8da   :  { %v1109_v16 = vpop.f32.mrb[10].mxu1 }
 0x8db   :  { %v1110_v17 = vadd.f32 %v2598_v62, %v1109_v16  ;;  %v2045_v19 = vpop.f32.mrb[11].mxu1 }
 0x8dd   :  { %2388 = vtanh.f32 %v1110_v17 }
 0x8e7   :  { %v2389_v21 = vpop.eup %2388  ;;  %v1116_v22 = vpop.permute.xlu1 %1115 }
 0x8e8   :  { %v1118_v24 = vsel %vm219_vm12, %v2389_v21, %v1116_v22  ;;  %1194 = vrot.lane.b32.xlu0 %v2389_v21, %s2409_s2 }
 0x8e9   :  { %2063 = vmatmul.mubr.msk.f32.vlgmr.msra.gmra.mrb[18].mxu0 %vm236_vm13, %v1118_v24 }
 0x8ea   :  { %2320 = vmatpush3.bf16.msra.mxu0 %v2545_v47  ;;  %2100 = vmatprep.mubr.msk.f32.mxu0 %vm2408_vm11, %v2407_v28 }
 0x8eb   :  { %2321 = vmatprep.subr.bf16.mxu0 %v2406_v14 }
 0x8ee   :  { %2323 = vmatpush3.bf16.msra.mxu0 %v2571_v55 }
 0x8ef   :  { %2324 = vmatprep.subr.bf16.mxu0 %v2406_v14 }
 0x8f2   :  { %2326 = vmatpush3.bf16.msra.mxu0 %v2580_v58 }
 0x8f3   :  { %2327 = vmatprep.subr.bf16.mxu0 %v2406_v14 }
 0x8f6   :  { %2329 = vmatpush3.bf16.msra.mxu0 %v2590_v61 }
 0x8f7   :  { %2342 = vmatprep.subr.bf16.mxu0 %v2406_v14 }
 0x95a   :  { %v1195_v25 = vpop.permute.xlu0 %1194 }
 0x95b   :  { %v1197_v26 = vsel %vm219_vm12, %v2609_v7, %v1195_v25 }
 0x95c   :  { %2082 = vmatmul.mubr.msk.f32.vlgmr.msra.gmra.mrb[12].mxu1 %vm236_vm13, %v1197_v26 }
 0x95d   :  { %2332 = vmatpush3.bf16.msra.mxu1 %v2489_v18  ;;  %2119 = vmatprep.mubr.msk.f32.mxu1 %vm2408_vm11, %v2407_v28 }
 0x95e   :  { %2333 = vmatprep.subr.bf16.mxu1 %v2406_v14 }
 0x961   :  { %2335 = vmatpush3.bf16.msra.mxu1 %v2495_v20 }
 0x962   :  { %2336 = vmatprep.subr.bf16.mxu1 %v2406_v14 }
 0x965   :  { %2338 = vmatpush3.bf16.msra.mxu1 %v2505_v23 }
 0x966   :  { %2339 = vmatprep.subr.bf16.mxu1 %v2406_v14 }
 0x969   :  { %2341 = vmatpush3.bf16.msra.mxu1 %v2530_v43 }
 0x96a   :  { %2354 = vmatprep.subr.bf16.mxu1 %v2406_v14 }
 0x9bc   :  { %v1188_v7 = vpop.f32.mrb[18].mxu0 }
 0x9bd   :  { %v1189_v18 = vadd.f32 %v2639_v12, %v1188_v7  ;;  %v2064_v27 = vpop.f32.mrb[19].mxu0 }
 0x9bf   :  { %2390 = vtanh.f32 %v1189_v18 }
 0x9c9   :  { %v2391_v29 = vpop.eup %2390 }
 0x9ca   :  { %1273 = vrot.lane.b32.xlu1 %v2391_v29, %s2409_s2 }
 0xa2f   :  { %v1267_v30 = vpop.f32.mrb[12].mxu1 }
 0xa30   :  { %v1268_v20 = vadd.f32 %v2598_v62, %v1267_v30  ;;  %v2083_v31 = vpop.f32.mrb[13].mxu1 }
 0xa32   :  { %2392 = vtanh.f32 %v1268_v20 }
 0xa3c   :  { %v2393_v23 = vpop.eup %2392  ;;  %v1274_v32 = vpop.permute.xlu1 %1273 }
 0xa3d   :  { %v1276_v33 = vsel %vm219_vm12, %v2393_v23, %v1274_v32  ;;  %1352 = vrot.lane.b32.xlu0 %v2393_v23, %s2409_s2 }
 0xa3e   :  { %2101 = vmatmul.mubr.msk.f32.vlgmr.msra.gmra.mrb[20].mxu0 %vm236_vm13, %v1276_v33 }
 0xa3f   :  { %2344 = vmatpush3.bf16.msra.mxu0 %v2545_v47  ;;  %2138 = vmatprep.mubr.msk.f32.mxu0 %vm2408_vm11, %v2407_v28 }
 0xa40   :  { %2345 = vmatprep.subr.bf16.mxu0 %v2406_v14 }
 0xa43   :  { %2347 = vmatpush3.bf16.msra.mxu0 %v2571_v55 }
 0xa44   :  { %2348 = vmatprep.subr.bf16.mxu0 %v2406_v14 }
 0xa47   :  { %2350 = vmatpush3.bf16.msra.mxu0 %v2580_v58 }
 0xa48   :  { %2351 = vmatprep.subr.bf16.mxu0 %v2406_v14 }
 0xa4b   :  { %2353 = vmatpush3.bf16.msra.mxu0 %v2590_v61 }
 0xaaf   :  { %v1353_v43 = vpop.permute.xlu0 %1352 }
 0xab0   :  { %v1355_v34 = vsel %vm219_vm12, %v2607_v6, %v1353_v43 }
 0xab1   :  { %2120 = vmatmul.mubr.msk.f32.vlgmr.msra.gmra.mrb[14].mxu1 %vm236_vm13, %v1355_v34 }
 0xab2   :  { %2149 = vmatprep.mubr.msk.f32.mxu1 %vm2408_vm11, %v2407_v28  ;;  %v1509_v28 = vld [vmem:[%s2835_s4] sm:$0xff] }
 0xab3   :  { %v2355_v41 = vpack.c.bf16 %v1510_v40, %v1509_v28 }
 0xab5   :  { %2356 = vmatpush3.bf16.msra.mxu1 %v2355_v41 }
 0xab6   :  { %2357 = vmatprep.subr.bf16.mxu1 %v2406_v14 }
 0xb11   :  { %v1346_v47 = vpop.f32.mrb[20].mxu0 }
 0xb12   :  { %v1347_v55 = vadd.f32 %v2639_v12, %v1346_v47  ;;  %v2102_v35 = vpop.f32.mrb[21].mxu0 }
 0xb14   :  { %2394 = vtanh.f32 %v1347_v55 }
 0xb1e   :  { %v2395_v36 = vpop.eup %2394 }
 0xb1f   :  { %1431 = vrot.lane.b32.xlu1 %v2395_v36, %s2409_s2 }
 0xb84   :  { %v1425_v58 = vpop.f32.mrb[14].mxu1 }
 0xb85   :  { %v1426_v61 = vadd.f32 %v2598_v62, %v1425_v58  ;;  %v2121_v37 = vpop.f32.mrb[15].mxu1  ;;  %v1511_v62 = vld [vmem:[%s2835_s4 + $0x10] sm:$0xff] }
 0xb86   :  { %v2358_v44 = vpack.c.bf16 %v1512_v42, %v1511_v62 }
 0xb87   :  { %2396 = vtanh.f32 %v1426_v61 }
 0xb88   :  { %2359 = vmatpush3.bf16.msra.mxu1 %v2358_v44 }
 0xb91   :  { %v2397_v38 = vpop.eup %2396  ;;  %v1432_v6 = vpop.permute.xlu1 %1431 }
 0xb92   :  { %v1434_v39 = vsel %vm219_vm12, %v2397_v38, %v1432_v6 }
 0xb93   :  { %2139 = vmatmul.mubr.msk.f32.vlgmr.msra.gmra.mrb[22].mxu0 %vm236_vm13, %v1434_v39 }
 0xc66   :  { %v1504_v45 = vpop.f32.mrb[22].mxu0 }
 0xc67   :  { %v1505_v46 = vadd.f32 %v2639_v12, %v1504_v45  ;;  %v2140_v48 = vpop.f32.mrb[23].mxu0 }
 0xc69   :  { %2398 = vtanh.f32 %v1505_v46 }
 0xc73   :  { %v2399_v49 = vpop.eup %2398 }
 0xc74   :  { %2150 = vmatmul.mubr.msk.f32.vlgmr.msra.gmra.mrb[16].mxu1 %vm219_vm12, %v2399_v49 }
 0xd47   :  { %v1589_v51 = vpop.f32.mrb[16].mxu1 }
 0xd48   :  { %v1590_v52 = vadd.f32 %v1654_v50, %v1589_v51  ;;  %v2151_v53 = vpop.f32.mrb[17].mxu1 }
 0xd4a   :  { %1593 = vmax.xlane.f32.xlu0 %v1590_v52 }
 0xdd7   :  { %v1594_v54 = vpop.xlane.xlu0 %1593 }
 0xdd8   :  { %v1595_v56 = vsub.f32 %v1590_v52, %v1594_v54 }
 0xdda   :  { %v1596_v14 = vmul.f32 1.442695, %v1595_v56 }
 0xddc   :  { %2400 = vpow2.f32 %v1596_v14 }
 0xde6   :  { %v2401_v57 = vpop.eup %2400 }
 0xde7   :  { %1598 = vadd.xlane.f32.xlu1 %v2401_v57 }
 0xe74   :  { %v1599_v12 = vpop.xlane.xlu1 %1598 }
 0xe75   :  { %2402 = vrcp.f32 %v1599_v12 }
 0xe7f   :  { %v2403_v59 = vpop.eup %2402 }
 0xe80   :  { %v1601_v60 = vmul.f32 %v2403_v59, %v1599_v12 }
 0xe82   :  { %v1602_v63 = vsub.f32 2.0, %v1601_v60 }
 0xe84   :  { %v1603_v0 = vmul.f32 %v2403_v59, %v1602_v63 }
 0xe86   :  { %v1604_v1 = vmul.f32 %v2401_v57, %v1603_v0 }
 0xe88   :  { %1605 = vst [vmem:[%s2837_s6] sm:$0xff] %v1604_v1 }

</bundles_post_ra>
